<compile_context>
chip_gen: v6e
topology: v6e:2x2x1
jax: 0.10.0
libtpu: 0.0.40
codegen_flags: <defaults>
</compile_context>

<pallas_src>
import math

import jax
import jax.numpy as jnp
import numpy as np
from jax.experimental import pallas as pl
from jax.experimental.pallas import tpu as pltpu

# TemporalEmbedding(embed_type='fixed', freq='h'): tables are month(13), day(32), weekday(7),
# hour(24); the minute term is 0.  x_mark feature order is [month, day, weekday, hour].
_TABLE_SIZES = (13, 32, 7, 24)
_TABLE_OFFSETS = []
_acc = 0
for _n in _TABLE_SIZES:
    _TABLE_OFFSETS.append(_acc)
    _acc += _n
_TABLE_OFFSETS = tuple(_TABLE_OFFSETS)        # (0, 13, 45, 52)
_T_TOTAL = _acc                               # 76


# ----------------------------- Pallas kernel -----------------------------
def _embed_kernel(x_ref, xm_ref, wc_ref, wt_ref, o_ref):
    """Fused TokenEmbedding (circular conv, k=3) + fixed TemporalEmbedding.

    x_ref  : (Bt, L, C)   f32   value series block
    xm_ref : (Bt, L, 4)   i32   time marks (month, day, weekday, hour)
    wc_ref : (3, C, Dp)   f32   conv taps, wc[k, c, d] == torch_w[d, c, k] (D zero-padded to Dp)
    wt_ref : (T,  Dp)     f32   concatenated fixed tables [month | day | weekday | hour]
    o_ref  : (Bt, L, Dp)  f32   output block (lane-dense, Dp % 128 == 0)
    """
    Bt, L, C = x_ref.shape
    T, Dp = wt_ref.shape
    BtL = Bt * L

    # ---- temporal embedding: multi-hot (BtL, T) @ table (T, Dp) on the MXU ----
    ids = xm_ref[...].reshape(BtL, 4)                                   # i32
    iota = jax.lax.broadcasted_iota(jnp.int32, (BtL, T), 1)
    mh = jnp.zeros((BtL, T), jnp.float32)
    for f, off in enumerate(_TABLE_OFFSETS):
        mh = mh + ((ids[:, f:f + 1] + off) == iota).astype(jnp.float32)
    acc = jnp.dot(mh, wt_ref[...], preferred_element_type=jnp.float32)  # (BtL, Dp)

    # ---- circular Conv1d: out[t] += sum_k x[(t + k - 1) mod L] @ W[k] ----
    x = x_ref[...]                                                      # (Bt, L, C)
    for k in range(3):
        s = (1 - k) % L        # roll so xs[:, t] = x[:, (t + k - 1) mod L]
        if s == 0:
            xs = x
        else:
            # time (sublane) rotation; cheap vs. the [*, Dp] output store this kernel is bound by
            xs = jnp.concatenate([x[:, L - s:, :], x[:, :L - s, :]], axis=1)
        acc = acc + jnp.dot(xs.reshape(BtL, C), wc_ref[k],
                            preferred_element_type=jnp.float32)

    o_ref[...] = acc.reshape(Bt, L, Dp).astype(o_ref.dtype)
    # NOTE: dropout(p=0.1) is the eval-mode identity here (inference path).


# ----------------------------- Wrapper -----------------------------
def _round_up(v, m):
    return ((v + m - 1) // m) * m


def _pick_block_b(B, L, C, Dp):
    """Largest batch block that (a) keeps in-kernel reshapes layout-exact, (b) fits a
    conservative double-buffered VMEM budget valid on v5e/v6e/v7x, (c) leaves >= 2 grid
    steps when possible so v7x's two TensorCores both get work via the parallel grid axis."""
    if L % 8 != 0:
        return 1
    per_b = 2 * (L * C * 4 + L * 4 * 4 + L * Dp * 4)        # x + x_mark + out, double-buffered
    cap = max(1, (24 * 1024 * 1024) // per_b)
    divisors = [d for d in range(1, B + 1) if B % d == 0 and d <= cap]
    multi_step = [d for d in divisors if (B // d) >= 2]
    return max(multi_step) if multi_step else max(divisors)


def data_embedding_wo_pos(x, x_mark, w_conv, w_table, d_model, *, block_b=None):
    """x: [B, L, C] f32, x_mark: [B, L, 4] int, w_conv: [3, C, Dp], w_table: [76, Dp] -> [B, L, d_model]."""
    B, L, C = x.shape
    _, _, Dp = w_conv.shape
    T = w_table.shape[0]
    x_mark = x_mark.astype(jnp.int32)

    if block_b is None:
        block_b = _pick_block_b(B, L, C, Dp)
    assert B % block_b == 0
    grid = (B // block_b,)

    bytes_accessed = (B * L * C * 4 + B * L * 4 * 4 + 3 * C * Dp * 4
                      + T * Dp * 4 + B * L * Dp * 4)
    flops = 2 * B * L * (3 * C + T) * Dp

    out = pl.pallas_call(
        _embed_kernel,
        out_shape=jax.ShapeDtypeStruct((B, L, Dp), jnp.float32),
        grid_spec=pltpu.PrefetchScalarGridSpec(
            num_scalar_prefetch=0,
            grid=grid,
            in_specs=[
                pl.BlockSpec((block_b, L, C), lambda b: (b, 0, 0)),
                pl.BlockSpec((block_b, L, 4), lambda b: (b, 0, 0)),
                pl.BlockSpec((3, C, Dp), lambda b: (0, 0, 0)),   # resident weights
                pl.BlockSpec((T, Dp), lambda b: (0, 0)),         # resident tables
            ],
            out_specs=pl.BlockSpec((block_b, L, Dp), lambda b: (b, 0, 0)),
        ),
        compiler_params=pltpu.CompilerParams(
            dimension_semantics=("parallel",),
            vmem_limit_bytes=48 * 1024 * 1024,   # below v7x's 64 MiB phys; plenty on v5e/v6e
        ),
        cost_estimate=pl.CostEstimate(
            flops=flops, transcendentals=0, bytes_accessed=bytes_accessed),
    )(x, x_mark, w_conv, w_table)

    return out if Dp == d_model else out[:, :, :d_model]


# ----------------------------- Parameter setup (glue) -----------------------------
def make_fixed_embedding_table(c_in, d_model):
    """FixedEmbedding sin/cos table, identical to the PyTorch construction."""
    w = np.zeros((c_in, d_model), dtype=np.float32)
    position = np.arange(0, c_in, dtype=np.float32)[:, None]
    div_term = np.exp(np.arange(0, d_model, 2, dtype=np.float32)
                      * -(math.log(10000.0) / d_model))
    w[:, 0::2] = np.sin(position * div_term)
    w[:, 1::2] = np.cos(position * div_term)
    return jnp.asarray(w)


def make_token_conv_weight(key, c_in, d_model, kernel_size=3):
    """kaiming_normal_(fan_in, leaky_relu) deterministic init; torch layout [D, C, K]."""
    fan_in = c_in * kernel_size
    gain = math.sqrt(2.0 / (1.0 + 0.01 ** 2))
    std = gain / math.sqrt(fan_in)
    return std * jax.random.normal(key, (d_model, c_in, kernel_size), dtype=jnp.float32)


def build_params(w_torch):
    """Pack torch conv weight [D, C, 3] + fixed temporal tables into the kernel operands,
    zero-padding d_model up to a lane-dense multiple of 128."""
    D, C, _ = w_torch.shape
    Dp = _round_up(D, 128)
    w_kcd = jnp.transpose(w_torch, (2, 1, 0))                                   # (3, C, D)
    table = jnp.concatenate(
        [make_fixed_embedding_table(n, D) for n in _TABLE_SIZES], axis=0)       # (76, D)
    if Dp != D:
        w_kcd = jnp.pad(w_kcd, ((0, 0), (0, 0), (0, Dp - D)))
        table = jnp.pad(table, ((0, 0), (0, Dp - D)))
    return w_kcd, table


# ----------------------------- Reference (pure JAX) -----------------------------
def temporal_embedding_fixed(x_mark, tables):
    month_t, day_t, weekday_t, hour_t = tables
    return (jnp.take(hour_t, x_mark[:, :, 3], axis=0)
            + jnp.take(weekday_t, x_mark[:, :, 2], axis=0)
            + jnp.take(day_t, x_mark[:, :, 1], axis=0)
            + jnp.take(month_t, x_mark[:, :, 0], axis=0))


def reference(x, x_mark, w_torch, tables):
    out = temporal_embedding_fixed(x_mark, tables)
    for k in range(3):
        xs = jnp.roll(x, shift=1 - k, axis=1)          # xs[:, t] = x[:, (t + k - 1) % L]
        out = out + jnp.einsum("blc,dc->bld", xs, w_torch[:, :, k])
    return out


# ----------------------------- Main -----------------------------
if __name__ == "__main__":
    B, L = 2, 8
    c_in, d_model = 4, 32

    key = jax.random.PRNGKey(0)
    k_x, k_w, k_m = jax.random.split(key, 3)

    x = jax.random.normal(k_x, (B, L, c_in), dtype=jnp.float32)
    km0, km1, km2, km3 = jax.random.split(k_m, 4)
    x_mark = jnp.stack(
        [
            jax.random.randint(km0, (B, L), 0, 13),   # month
            jax.random.randint(km1, (B, L), 0, 32),   # day
            jax.random.randint(km2, (B, L), 0, 7),    # weekday
            jax.random.randint(km3, (B, L), 0, 24),   # hour
        ],
        axis=-1,
    ).astype(jnp.int32)

    w_torch = make_token_conv_weight(k_w, c_in, d_model)     # [D, C, 3] torch layout
    w_conv, w_table = build_params(w_torch)                  # [3, C, Dp], [76, Dp]

    out = data_embedding_wo_pos(x, x_mark, w_conv, w_table, d_model)
    out = jax.block_until_ready(out)

    tables = tuple(make_fixed_embedding_table(n, d_model) for n in _TABLE_SIZES)
    ref = reference(x, x_mark, w_torch, tables)
    np.testing.assert_allclose(np.asarray(out), np.asarray(ref), rtol=1e-5, atol=1e-5)

    print("KERNEL_OK")
</pallas_src>

<mosaic_0001>
module attributes {stable_mosaic.version = 11 : i64} {
  func.func @_embed_kernel(%arg0: i32, %arg1: memref<1x8x4xf32, #tpu.memory_space<vmem>>, %arg2: memref<1x8x4xi32, #tpu.memory_space<vmem>>, %arg3: memref<3x4x128xf32, #tpu.memory_space<vmem>>, %arg4: memref<76x128xf32, #tpu.memory_space<vmem>>, %arg5: memref<1x8x128xf32, #tpu.memory_space<vmem>>) attributes {dimension_semantics = [#tpu.dimension_semantics<parallel>], iteration_bounds = array<i64: 2>, scalar_prefetch = 0 : i64, scratch_operands = 0 : i64, tpu.core_type = #tpu.core_type<tc>, window_params = [{transform_indices = @transform_0, window_bounds = array<i64: 1, 8, 4>}, {transform_indices = @transform_1, window_bounds = array<i64: 1, 8, 4>}, {pipeline_mode = #tpu.pipeline_mode<synchronous>, transform_indices = @transform_2, window_bounds = array<i64: 3, 4, 128>}, {pipeline_mode = #tpu.pipeline_mode<synchronous>, transform_indices = @transform_3, window_bounds = array<i64: 76, 128>}, {transform_indices = @transform_4, window_bounds = array<i64: 1, 8, 128>}]} {
    %c0 = arith.constant 0 : index
    %c0_0 = arith.constant 0 : index
    %c0_1 = arith.constant 0 : index
    %0 = vector.load %arg2[%c0, %c0_0, %c0_1] : memref<1x8x4xi32, #tpu.memory_space<vmem>>, vector<1x8x4xi32>
    %1 = vector.shape_cast %0 : vector<1x8x4xi32> to vector<8x4xi32>
    %2 = tpu.iota {dimensions = array<i32: 1>} : vector<8x76xi32>
    %cst = arith.constant 0.000000e+00 : f32
    %3 = vector.broadcast %cst : f32 to vector<8x76xf32>
    %4 = vector.extract_strided_slice %1 {offsets = [0, 0], sizes = [8, 1], strides = [1, 1]} : vector<8x4xi32> to vector<8x1xi32>
    %c0_i32 = arith.constant 0 : i32
    %5 = vector.broadcast %c0_i32 : i32 to vector<8x1xi32>
    %6 = arith.addi %4, %5 : vector<8x1xi32>
    %7 = vector.broadcast %6 : vector<8x1xi32> to vector<8x76xi32>
    %8 = arith.cmpi eq, %7, %2 : vector<8x76xi32>
    %9 = arith.extui %8 : vector<8x76xi1> to vector<8x76xi32>
    %10 = arith.sitofp %9 : vector<8x76xi32> to vector<8x76xf32>
    %11 = arith.addf %3, %10 : vector<8x76xf32>
    %12 = vector.extract_strided_slice %1 {offsets = [0, 1], sizes = [8, 1], strides = [1, 1]} : vector<8x4xi32> to vector<8x1xi32>
    %c13_i32 = arith.constant 13 : i32
    %13 = vector.broadcast %c13_i32 : i32 to vector<8x1xi32>
    %14 = arith.addi %12, %13 : vector<8x1xi32>
    %15 = vector.broadcast %14 : vector<8x1xi32> to vector<8x76xi32>
    %16 = arith.cmpi eq, %15, %2 : vector<8x76xi32>
    %17 = arith.extui %16 : vector<8x76xi1> to vector<8x76xi32>
    %18 = arith.sitofp %17 : vector<8x76xi32> to vector<8x76xf32>
    %19 = arith.addf %11, %18 : vector<8x76xf32>
    %20 = vector.extract_strided_slice %1 {offsets = [0, 2], sizes = [8, 1], strides = [1, 1]} : vector<8x4xi32> to vector<8x1xi32>
    %c45_i32 = arith.constant 45 : i32
    %21 = vector.broadcast %c45_i32 : i32 to vector<8x1xi32>
    %22 = arith.addi %20, %21 : vector<8x1xi32>
    %23 = vector.broadcast %22 : vector<8x1xi32> to vector<8x76xi32>
    %24 = arith.cmpi eq, %23, %2 : vector<8x76xi32>
    %25 = arith.extui %24 : vector<8x76xi1> to vector<8x76xi32>
    %26 = arith.sitofp %25 : vector<8x76xi32> to vector<8x76xf32>
    %27 = arith.addf %19, %26 : vector<8x76xf32>
    %28 = vector.extract_strided_slice %1 {offsets = [0, 3], sizes = [8, 1], strides = [1, 1]} : vector<8x4xi32> to vector<8x1xi32>
    %c52_i32 = arith.constant 52 : i32
    %29 = vector.broadcast %c52_i32 : i32 to vector<8x1xi32>
    %30 = arith.addi %28, %29 : vector<8x1xi32>
    %31 = vector.broadcast %30 : vector<8x1xi32> to vector<8x76xi32>
    %32 = arith.cmpi eq, %31, %2 : vector<8x76xi32>
    %33 = arith.extui %32 : vector<8x76xi1> to vector<8x76xi32>
    %34 = arith.sitofp %33 : vector<8x76xi32> to vector<8x76xf32>
    %35 = arith.addf %27, %34 : vector<8x76xf32>
    %c0_2 = arith.constant 0 : index
    %c0_3 = arith.constant 0 : index
    %36 = vector.load %arg4[%c0_2, %c0_3] : memref<76x128xf32, #tpu.memory_space<vmem>>, vector<76x128xf32>
    %cst_4 = arith.constant dense<0.000000e+00> : vector<8x128xf32>
    %37 = tpu.matmul %35, %36, %cst_4 {dimension_numbers = #tpu.dot_dimension_numbers<[1], [0], [0], [1], [0, 0, 1, 1], [], []>} : vector<8x76xf32>, vector<76x128xf32>, vector<8x128xf32> -> vector<8x128xf32>
    %c0_5 = arith.constant 0 : index
    %c0_6 = arith.constant 0 : index
    %c0_7 = arith.constant 0 : index
    %38 = vector.load %arg1[%c0_5, %c0_6, %c0_7] : memref<1x8x4xf32, #tpu.memory_space<vmem>>, vector<1x8x4xf32>
    %39 = vector.extract_strided_slice %38 {offsets = [0, 7, 0], sizes = [1, 1, 4], strides = [1, 1, 1]} : vector<1x8x4xf32> to vector<1x1x4xf32>
    %40 = vector.extract_strided_slice %38 {offsets = [0, 0, 0], sizes = [1, 7, 4], strides = [1, 1, 1]} : vector<1x8x4xf32> to vector<1x7x4xf32>
    %41 = tpu.concatenate %39, %40 in 1 : vector<1x1x4xf32>, vector<1x7x4xf32> -> vector<1x8x4xf32>
    %42 = vector.shape_cast %41 : vector<1x8x4xf32> to vector<8x4xf32>
    %c0_8 = arith.constant 0 : index
    %c0_9 = arith.constant 0 : index
    %c0_10 = arith.constant 0 : index
    %43 = vector.load %arg3[%c0_8, %c0_9, %c0_10] : memref<3x4x128xf32, #tpu.memory_space<vmem>>, vector<1x4x128xf32>
    %44 = vector.shape_cast %43 : vector<1x4x128xf32> to vector<4x128xf32>
    %cst_11 = arith.constant dense<0.000000e+00> : vector<8x128xf32>
    %45 = tpu.matmul %42, %44, %cst_11 {dimension_numbers = #tpu.dot_dimension_numbers<[1], [0], [0], [1], [0, 0, 1, 1], [], []>} : vector<8x4xf32>, vector<4x128xf32>, vector<8x128xf32> -> vector<8x128xf32>
    %46 = arith.addf %37, %45 : vector<8x128xf32>
    %47 = vector.shape_cast %38 : vector<1x8x4xf32> to vector<8x4xf32>
    %c1 = arith.constant 1 : index
    %c0_12 = arith.constant 0 : index
    %c0_13 = arith.constant 0 : index
    %48 = vector.load %arg3[%c1, %c0_12, %c0_13] : memref<3x4x128xf32, #tpu.memory_space<vmem>>, vector<1x4x128xf32>
    %49 = vector.shape_cast %48 : vector<1x4x128xf32> to vector<4x128xf32>
    %cst_14 = arith.constant dense<0.000000e+00> : vector<8x128xf32>
    %50 = tpu.matmul %47, %49, %cst_14 {dimension_numbers = #tpu.dot_dimension_numbers<[1], [0], [0], [1], [0, 0, 1, 1], [], []>} : vector<8x4xf32>, vector<4x128xf32>, vector<8x128xf32> -> vector<8x128xf32>
    %51 = arith.addf %46, %50 : vector<8x128xf32>
    %52 = vector.extract_strided_slice %38 {offsets = [0, 1, 0], sizes = [1, 7, 4], strides = [1, 1, 1]} : vector<1x8x4xf32> to vector<1x7x4xf32>
    %53 = vector.extract_strided_slice %38 {offsets = [0, 0, 0], sizes = [1, 1, 4], strides = [1, 1, 1]} : vector<1x8x4xf32> to vector<1x1x4xf32>
    %54 = tpu.concatenate %52, %53 in 1 : vector<1x7x4xf32>, vector<1x1x4xf32> -> vector<1x8x4xf32>
    %55 = vector.shape_cast %54 : vector<1x8x4xf32> to vector<8x4xf32>
    %c2 = arith.constant 2 : index
    %c0_15 = arith.constant 0 : index
    %c0_16 = arith.constant 0 : index
    %56 = vector.load %arg3[%c2, %c0_15, %c0_16] : memref<3x4x128xf32, #tpu.memory_space<vmem>>, vector<1x4x128xf32>
    %57 = vector.shape_cast %56 : vector<1x4x128xf32> to vector<4x128xf32>
    %cst_17 = arith.constant dense<0.000000e+00> : vector<8x128xf32>
    %58 = tpu.matmul %55, %57, %cst_17 {dimension_numbers = #tpu.dot_dimension_numbers<[1], [0], [0], [1], [0, 0, 1, 1], [], []>} : vector<8x4xf32>, vector<4x128xf32>, vector<8x128xf32> -> vector<8x128xf32>
    %59 = arith.addf %51, %58 : vector<8x128xf32>
    %60 = vector.shape_cast %59 : vector<8x128xf32> to vector<1x8x128xf32>
    %c0_18 = arith.constant 0 : index
    %c0_19 = arith.constant 0 : index
    %c0_20 = arith.constant 0 : index
    %61 = vector.load %arg5[%c0_18, %c0_19, %c0_20] : memref<1x8x128xf32, #tpu.memory_space<vmem>>, vector<1x8x128xf32>
    tpu.vector_store %arg5[%c0_18, %c0_19, %c0_20], %60 {strides = array<i32>} : memref<1x8x128xf32, #tpu.memory_space<vmem>>, vector<1x8x128xf32>,
    return
  }
  func.func @transform_0(%arg0: i32) -> (i32, i32, i32) {
    %c0_i32 = arith.constant 0 : i32
    %c0_i32_0 = arith.constant 0 : i32
    %c0_i32_1 = arith.constant 0 : i32
    return %arg0, %c0_i32, %c0_i32_0 : i32, i32, i32
  }
  func.func @transform_1(%arg0: i32) -> (i32, i32, i32) {
    %c0_i32 = arith.constant 0 : i32
    %c0_i32_0 = arith.constant 0 : i32
    %c0_i32_1 = arith.constant 0 : i32
    return %arg0, %c0_i32, %c0_i32_0 : i32, i32, i32
  }
  func.func @transform_2(%arg0: i32) -> (i32, i32, i32) {
    %c0_i32 = arith.constant 0 : i32
    %c0_i32_0 = arith.constant 0 : i32
    %c0_i32_1 = arith.constant 0 : i32
    %c0_i32_2 = arith.constant 0 : i32
    return %c0_i32, %c0_i32_0, %c0_i32_1 : i32, i32, i32
  }
  func.func @transform_3(%arg0: i32) -> (i32, i32) {
    %c0_i32 = arith.constant 0 : i32
    %c0_i32_0 = arith.constant 0 : i32
    %c0_i32_1 = arith.constant 0 : i32
    return %c0_i32, %c0_i32_0 : i32, i32
  }
  func.func @transform_4(%arg0: i32) -> (i32, i32, i32) {
    %c0_i32 = arith.constant 0 : i32
    %c0_i32_0 = arith.constant 0 : i32
    %c0_i32_1 = arith.constant 0 : i32
    return %arg0, %c0_i32, %c0_i32_0 : i32, i32, i32
  }
}

</mosaic_0001>

<bundles_post_ra>
// kernel: tpu_custom_call.1
= control target key start
LH: loop header
LB: loop body
LE: loop exit
PB: predicated region body
PF: predicated region fallthrough
CT: control target
= control target key end

     0   :  { %9 = vsyncpa [#allocation3], 0  ;;  %s1111_s0 = inlined_call_operand.vmem [shape: f32[2,8,4], index: 0, kind: input, shape index: {}]   ;;  %s1112_s1 = inlined_call_operand.vmem [shape: s32[2,8,4], index: 1, kind: input, shape index: {}]   ;;  %s1113_s2 = inlined_call_operand.vmem [shape: f32[3,4,128], index: 2, kind: input, shape index: {}]   ;;  %s1114_s3 = inlined_call_operand.hbm [shape: f32[76,128], index: 3, kind: input, shape index: {}]   ;;  %s1115_s4 = inlined_call_operand.hbm [shape: f32[2,8,128], index: 4, kind: output, shape index: {}]  }
   0x1   :  { %10 = vsyncpa [#allocation4], 0 }
   0x2   :  { %12 = vsyncpa [#allocation4 + $0x1], 0  ;;  %s962_s15 = smov 0   ;;  %s964_s16 = smov 0  }
   0x3   :  { %s966_s17 = smov 0   ;;  %s968_s18 = smov 0  }
   0x4 LB: > { %s983_s19 = sadd.s32 4294967295, %s925_s18   ;;  %s690_s20 = sadd.s32 4294967294, %s925_s18   ;;  %s925_s18 = sphi %s968_s18, %s1123_s18   ;;  %s921_s17 = sphi %s966_s17, %s1122_s17   ;;  %s917_s16 = sphi %s964_s16, %s1121_s16   ;;  %s913_s15 = sphi %s962_s15, %s1120_s15  }
   0x5   : > { %s987_s21 = sadd.s32 1, %s925_s18   ;;  %s119_s22 = sadd.s32 1, %s921_s17 }
   0x6   : > { %s116_s23 = ssub.s32 %s925_s18, %s987_s21  ;;  %p129_p0 = scmp.ne.s32.totalorder %s921_s17, %s917_s16 }
   0x7   : > { %p117_p1 = scmp.eq.s32.totalorder %s116_s23, 0  ;;  %p130_p2 = scmp.eq.s32.totalorder %s983_s19, 1 }
   0x8   : > { %p135_p3 = scmp.ne.s32.totalorder %s917_s16, %s913_s15  ;;  %p136_p4 = scmp.eq.s32.totalorder %s690_s20, 1 }
   0x9   : > { %s998_s24 = scalar_select %p117_p1, %s921_s17, %s119_s22  }
   0xa   : > { %p1000_p5 = por %p130_p2, %p129_p0  ;;  %p1004_p6 = por %p136_p4, %p135_p3 }
   0xb   : > { %p691_p7 = scmp.ge.s32.totalorder %s925_s18, 1  ;;  %p143_p8 = scmp.lt.s32.totalorder %s925_s18, 3 }
   0xc   : > { %s1117_s26 = scalar_select %p1004_p6, 1, 0 }
   0xd   : > { %p786_p9 = scmp.eq.s32.totalorder %s983_s19, 0  ;;  %p1011_p10 = pnand %p691_p7, %p143_p8 }
   0xe   : > { %s927_s28 = smov [#allocation2]  }
   0xf   : > { %s158_s29 = sshll.u32 %s927_s28, 4  ;;  %p778_p11 = pneg %p1011_p10  ;;  %s159_s29 = int_to_ptr.vmem [resolvable:$true] %s158_s29 }
  0x10   : > { %s846_s30 = scalar_lea.vmem %s159_s29, 1280  ;;  %p854_p3 = scmp.lt.s32.totalorder %s159_s29, %s159_s29 }
  0x11   : > { %p779_p12 = pnand %p786_p9, %p778_p11  ;;  %p847_p0 = scmp.ne.s32.totalorder %s159_s29, %s846_s30 }
  0x12   : > { %p855_p4 = scmp.lt.s32.totalorder %s846_s30, %s846_s30 }
  0x13   : > { %p837_p13 = pneg %p779_p12 }
  0x14   : > { %p856_p6 = por %p855_p4, %p854_p3 }
  0x15   : > { %p849_p1 = pnand %p847_p0, %p837_p13 }
  0x17   : > { %p850_p2 = pneg %p849_p1 }
  0x19   : > { %p857_p7 = pnand %p856_p6, %p850_p2 }
  0x1b   : > { %860 = shalt.err (!%p857_p7)
}
  0x1c   : > { %s928_s5 = smov 128   ;;  %s929_s6 = smov 8  }
  0x1d   : > { %781 = dma.hbm_to_vmem [thread:$0]  (!%p779_p12), %s1114_s3, 1280, %s159_s29, [#allocation3], %s928_s5, %s928_s5, %s929_s6  }
  0x1e   : > { %188 = sbr.rel (%p1011_p10) target bundleno = 392 (0x188), region = 36 }
  0x23   : > { %904 = dma.done.wait (%p786_p9), [#allocation3], 1280  }
  0x24   : > { %906 = vsyncadd (%p786_p9), [#allocation3], 4294966016  ;;  %p217_p8 = scmp.lt.s32.totalorder %s983_s19, 1  ;;  %v930_v0 = vmov 0   ;;  %v931_v1 = vmov 2   ;;  %v932_v2 = vmov 0.0   ;;  %v226_v25 = vlaneseq }
  0x25   : > { %830 = vset.pattern.permute.xlu0 %v930_v0  ;;  %832 = vset.pattern.permute.xlu1 %v931_v1  ;;  %vm280_vm0 = vcmask 1043456   ;;  %v268_v4 = vld [vmem:[#allocation2 + $0x48] sm:$0xf]  ;;  %v267_v6 = vld [vmem:[#allocation2 + $0x40] sm:$0xff]  ;;  %v266_v8 = vld [vmem:[#allocation2 + $0x38] sm:$0xff]  ;;  %v933_v13 = vmov 1  }
  0x26   : > { %s218_s9 = scalar_select %p217_p8, %s983_s19, 1  ;;  %739 = vmatprep.subr.mxu1 %v932_v2  ;;  %734 = vmatprep.subr.mxu0 %v932_v2  ;;  %v275_v10 = vld [vmem:[%s1113_s2] sm:$0xf]  ;;  %v265_v12 = vld [vmem:[#allocation2 + $0x30] sm:$0xff]  ;;  %v264_v14 = vld [vmem:[#allocation2 + $0x28] sm:$0xff]  ;;  %v934_v16 = vmov 3  }
  0x27   : > { %740 = vmatpush3.msk.msra.mxu1 %vm280_vm0, %v268_v4  ;;  %735 = vmatpush3.msk.msra.mxu0 %vm280_vm0, %v275_v10  ;;  %vm276_vm1 = vcmask 31744   ;;  %v263_v17 = vld [vmem:[#allocation2 + $0x20] sm:$0xff]  ;;  %vm935_vm2 = vmmov 0   ;;  %v262_v19 = vld [vmem:[#allocation2 + $0x18] sm:$0xff]  ;;  %v261_v20 = vld [vmem:[#allocation2 + $0x10] sm:$0xff]  ;;  %v227_v26 = vand.u32 127, %v226_v25 }
  0x28   : > { %s697_s10 = sshll.u32 %s218_s9, 3  ;;  %741 = vmatprep.subr.mxu1 %v932_v2  ;;  %736 = vmatprep.mubr.msk.f32.mxu0 %vm935_vm2, %v932_v2  ;;  %v707_v18 = vld [vmem:[%s1113_s2 + $0x4] sm:$0xf]  ;;  %v260_v21 = vld [vmem:[#allocation2 + $0x8] sm:$0xff]  ;;  %vm354_vm7 = vcmask 621568   ;;  %s214_s6 = sand.u32 1, %s917_s16  }
  0x29   : > { %s224_s13 = scalar_lea.vmem %s1112_s1, %s697_s10  ;;  %s220_s22 = scalar_lea.vmem %s1111_s0, %s697_s10  ;;  %742 = vmatpush3.msra.mxu1 %v267_v6  ;;  %762 = vmatprep.subr.mxu0 %v932_v2  ;;  %v710_v22 = vld [vmem:[%s1113_s2 + $0x8] sm:$0xf]  ;;  %v259_v24 = vld [vmem:[#allocation2] sm:$0xff] }
  0x2a   : > { %v225_v3 = vld [vmem:[%s224_s13] sm:$0xff]  ;;  %743 = vmatprep.subr.mxu1 %v932_v2  ;;  %759 = vmatprep.mubr.msk.f32.mxu1 %vm935_vm2, %v932_v2  ;;  %s696_s7 = sshll.u32 %s214_s6, 3  ;;  %s714_s8 = sshll.u32 %s983_s19, 7 }
  0x2b   : > { %229 = vperm.xlu0 %830, %v225_v3   ;;  %v243_v5 = vadd.s32 45, %v225_v3  ;;  %v235_v7 = vadd.s32 13, %v225_v3  ;;  %v269_v9 = vld [vmem:[%s220_s22] sm:$0xff]  ;;  %v251_v11 = vadd.s32 52, %v225_v3  ;;  %744 = vmatpush3.msra.mxu1 %v266_v8  ;;  %s216_s9 = scalar_lea.vmem [#allocation5], %s696_s7  ;;  %s605_s13 = scalar_lea.hbm %s1115_s4, %s714_s8 }
  0x2c   : > { %745 = vmatprep.subr.mxu1 %v932_v2  ;;  %v271_v15 = vrot.slane %v269_v9, 7  ;;  %v509_v23 = vrot.slane %v269_v9, 1  ;;  %s607_s10 = sshll.u32 %s216_s9, 4  ;;  %s594_s14 = scalar_lea.sflag [#allocation4], %s214_s6  ;;  %s608_s10 = int_to_ptr.vmem [resolvable:$true] %s607_s10 }
  0x2d   : > { %245 = vperm.xlu1 %832, %v243_v5   ;;  %746 = vmatpush3.msra.mxu1 %v265_v12  ;;  %s861_s20 = scalar_lea.vmem %s608_s10, 128  ;;  %s936_s22 = smov [#allocation5]  }
  0x2e   : > { %747 = vmatprep.subr.mxu1 %v932_v2  ;;  %737 = vmatmul.mubr.msk.f32.vlgmr.msra.gmra.mxu0 %vm276_vm1, %v271_v15  ;;  %p862_p6 = scmp.ne.s32.totalorder %s608_s10, %s861_s20  ;;  %s865_s23 = sshll.u32 %s936_s22, 4  ;;  %s866_s23 = int_to_ptr.vmem [resolvable:$false] %s865_s23 }
  0x2f   : > { %831 = vset.pattern.permute.xlu0 %v933_v13  ;;  %748 = vmatpush3.msra.mxu1 %v264_v14  ;;  %s867_s19 = scalar_lea.vmem %s866_s23, 256  ;;  %p868_p11 = scmp.lt.s32.totalorder %s608_s10, %s866_s23 }
  0x30   : > { %237 = vperm.xlu0 %831, %v235_v7   ;;  %749 = vmatprep.subr.mxu1 %v932_v2  ;;  %p863_p9 = pnand %p862_p6, %p1000_p5  ;;  %p869_p12 = scmp.lt.s32.totalorder %s867_s19, %s861_s20 }
  0x31   : > { %833 = vset.pattern.permute.xlu1 %v934_v16  ;;  %750 = vmatpush3.msra.mxu1 %v263_v17 }
  0x32   : > { %253 = vperm.xlu1 %833, %v251_v11   ;;  %751 = vmatprep.subr.mxu1 %v932_v2  ;;  %p864_p10 = pneg %p863_p9  ;;  %p870_p13 = por %p869_p12, %p868_p11 }
  0x33   : > { %763 = vmatpush3.msk.msra.mxu0 %vm280_vm0, %v707_v18  ;;  %752 = vmatpush3.msra.mxu1 %v262_v19 }
  0x34   : > { %764 = vmatprep.mubr.msk.f32.mxu0 %vm935_vm2, %v932_v2  ;;  %753 = vmatprep.subr.mxu1 %v932_v2  ;;  %p871_p0 = pnand %p870_p13, %p864_p10 }
  0x35   : > { %765 = vmatmul.mubr.msk.f32.vlgmr.msra.gmra.mxu0 %vm276_vm1, %v269_v9  ;;  %754 = vmatpush3.msra.mxu1 %v261_v20 }
  0x36   : > { %755 = vmatprep.subr.mxu1 %v932_v2  ;;  %767 = vmatprep.subr.mxu0 %v932_v2 }
  0x37   : > { %756 = vmatpush3.msra.mxu1 %v260_v21  ;;  %768 = vmatpush3.msk.msra.mxu0 %vm280_vm0, %v710_v22 }
  0x38   : > { %757 = vmatprep.subr.mxu1 %v932_v2  ;;  %769 = vmatprep.mubr.msk.f32.mxu0 %vm935_vm2, %v932_v2 }
  0x39   : > { %758 = vmatpush3.msra.mxu1 %v259_v24  ;;  %770 = vmatmul.mubr.msk.f32.vlgmr.msra.gmra.mxu0 %vm276_vm1, %v509_v23 }
  0x3a   : > { %834 = vset.pattern.permute.xlu0 %v934_v16 }
  0xa6   : > { %v230_v27 = vpop.permute.xlu0 %229 }
  0xa7   : > { %vm231_vm3 = vcmp.eq.s32.totalorder %v230_v27, %v227_v26 }
  0xa8   : > { %v246_v28 = vpop.permute.xlu1 %245  ;;  %v699_v30 = vsel %vm231_vm3, 1.0, %v932_v2 }
  0xa9   : > { %vm247_vm4 = vcmp.eq.s32.totalorder %v246_v28, %v227_v26 }
  0xaa   : > { %v701_v34 = vsel %vm247_vm4, 1.0, %v932_v2 }
  0xab   : > { %v238_v29 = vpop.permute.xlu0 %237 }
  0xac   : > { %vm239_vm5 = vcmp.eq.s32.totalorder %v238_v29, %v227_v26 }
  0xad   : > { %v700_v31 = vsel %vm239_vm5, 1.0, %v932_v2  ;;  %v254_v32 = vpop.permute.xlu1 %253 }
  0xae   : > { %v242_v33 = vadd.f32 %v700_v31, %v699_v30  ;;  %vm255_vm6 = vcmp.eq.s32.totalorder %v254_v32, %v227_v26 }
  0xaf   : > { %v702_v35 = vsel %vm255_vm6, 1.0, %v932_v2 }
  0xb0   : > { %v250_v36 = vadd.f32 %v701_v34, %v242_v33 }
  0xb2   : > { %v258_v37 = vadd.f32 %v702_v35, %v250_v36 }
  0xb4   : > { %760 = vmatmul.mubr.msk.f32.vlgmr.msra.gmra.mxu1 %vm354_vm7, %v258_v37 }
  0xee   : > { %v350_v38 = vpop.f32.mrf.mxu0 }
  0xf0   : > { %v738_v39 = vpop.f32.mrf.mxu0 }
  0xf5   : > { %v504_v40 = vpop.f32.mrf.mxu0 }
  0xf7   : > { %v766_v41 = vpop.f32.mrf.mxu0 }
  0xf9   : > { %v587_v42 = vpop.f32.mrf.mxu0 }
  0xfb   : > { %v771_v43 = vpop.f32.mrf.mxu0 }
 0x174   : > { %v427_v44 = vpop.f32.mrf.mxu1 }
 0x175   : > { %v428_v45 = vadd.f32 %v427_v44, %v350_v38 }
 0x176   : > { %v761_v46 = vpop.f32.mrf.mxu1 }
 0x177   : > { %v508_v47 = vadd.f32 %v504_v40, %v428_v45 }
 0x179   : > { %v591_v48 = vadd.f32 %v587_v42, %v508_v47 }
 0x17b   : > { %592 = vst [vmem:[%s216_s9] sm:$0xff] %v591_v48 }
 0x17c   : > { %874 = shalt.err (!%p871_p0)
}
 0x17d   : > { %s875_s27 = scalar_lea.hbm %s605_s13, 128  ;;  %s879_s30 = scalar_lea.hbm %s1115_s4, 256 }
 0x17e   : > { %p876_p1 = scmp.ne.s32.totalorder %s605_s13, %s875_s27  ;;  %p880_p4 = scmp.lt.s32.totalorder %s605_s13, %s1115_s4 }
 0x17f   : > { %p881_p7 = scmp.lt.s32.totalorder %s879_s30, %s875_s27 }
 0x180   : > { %p877_p2 = pnand %p876_p1, %p1000_p5 }
 0x181   : > { %p882_p8 = por %p881_p7, %p880_p4 }
 0x182   : > { %p878_p3 = pneg %p877_p2 }
 0x184   : > { %p883_p6 = pnand %p882_p8, %p878_p3 }
 0x186   : > { %886 = shalt.err (!%p883_p6)
}
 0x187   : > { %776 = dma.vmem_to_hbm [thread:$0]  (%p1000_p5), %s608_s10, 128, %s605_s13, %s594_s14  }
 0x188 PF: > { %p788_p9 = scmp.ge.s32.totalorder %s925_s18, 2  ;;  %s619_s7 = sand.u32 1, %s913_s15  }
 0x189   : > { %p1119_p10 = scmp.ne.s32.totalorder %s1117_s26, 0  ;;  %s620_s8 = scalar_lea.sflag [#allocation4], %s619_s7 }
 0x18b   : > { %p783_p11 = pnand %p788_p9, %p1119_p10 }
 0x18d   : > { %p784_p12 = pneg %p783_p11 }
 0x18f   : > { %908 = dma.done.wait (%p784_p12), %s620_s8, 128  }
 0x190   : > { %910 = vsyncadd (%p784_p12), %s620_s8, 4294967168  ;;  %p15_p13 = scmp.ge.s32.totalorder %s987_s21, 4   ;;  %s1120_s15 = smov %s917_s16 }
 0x191   : > { %s1121_s16 = smov %s921_s17  ;;  %s1122_s17 = smov %s998_s24 }
 0x192   : > { %s1123_s18 = smov %s987_s21  ;;  %17 = sbr.rel (!%p15_p13) target bundleno = 4 (0x4), region = 81 }
 0x197   :  { %625 = vsyncpa [#allocation3], 1 }
 0x198   :  { %627 = vsyncpa [#allocation3 + $0x1], 1 }
 0x199   :  { %628 = vsyncpa [#allocation4], 1 }
 0x19a   :  { %630 = vsyncpa [#allocation4 + $0x1], 1 }

</bundles_post_ra>
